<compile_context>
chip_gen: v6e
topology: v6e:2x2x1
jax: 0.10.0
libtpu: 0.0.40
codegen_flags: <defaults>
</compile_context>

<pallas_src>
import jax
import jax.numpy as jnp
from jax.experimental import pallas as pl
from jax.experimental.pallas import tpu as pltpu


def _round_up(v, m):
    return ((v + m - 1) // m) * m


def _cdiv(a, b):
    return (a + b - 1) // b


def _pad2d(a, rows, cols):
    r, c = a.shape
    if r == rows and c == cols:
        return a
    return jnp.pad(a, ((0, rows - r), (0, cols - c)))


def _mlp_kernel(x_ref, w1_ref, b1_ref, w2_ref, b2_ref, o_ref):
    """out = relu(x @ w1 + b1) @ w2 + b2 for one (TB, K) batch tile."""
    # fc1: in-kernel f32 -> bf16 cast of x, MXU matmul with f32 accumulation.
    x = x_ref[...].astype(jnp.bfloat16)
    h = jnp.dot(x, w1_ref[...], preferred_element_type=jnp.float32)
    h = jnp.maximum(h + b1_ref[...], 0.0)                   # (TB, Hp) f32
    # fc2: bf16 MXU inputs, f32 accumulation; bias add + store in f32.
    out = jnp.dot(h.astype(jnp.bfloat16), w2_ref[...],
                  preferred_element_type=jnp.float32)
    o_ref[...] = (out + b2_ref[...]).astype(o_ref.dtype)


def prepare_params(w1, b1, w2, b2):
    """One-time prep (outside the per-call path): pad the hidden dim to a
    lane-dense multiple of 128 and cast matmul weights to bf16.
    Weights are (in_features, out_features) — transposed vs nn.Linear."""
    K, H = w1.shape
    O = w2.shape[1]
    Hp = _round_up(H, 128)
    w1_p = _pad2d(jnp.asarray(w1, jnp.float32), K, Hp).astype(jnp.bfloat16)
    b1_p = _pad2d(jnp.asarray(b1, jnp.float32).reshape(1, -1), 1, Hp)
    w2_p = _pad2d(jnp.asarray(w2, jnp.float32), Hp, O).astype(jnp.bfloat16)
    b2_p = jnp.asarray(b2, jnp.float32).reshape(1, -1)
    return w1_p, b1_p, w2_p, b2_p


def customer_segmentation_forward(x, w1_p, b1_p, w2_p, b2_p, *,
                                  batch_tile=1024):
    """x: (B, K) f32; params from prepare_params(). Returns (B, O) f32."""
    B, K = x.shape
    Kw, Hp = w1_p.shape
    O = w2_p.shape[1]
    assert Kw == K, "params must come from prepare_params() (w1 shape (K, Hp))"

    # --- batch tiling -------------------------------------------------------
    # Largest tile <= batch_tile, balanced across grid steps (minimizes batch
    # padding waste).  For large B force >= 2 steps so both v7x TensorCores
    # get work on the "parallel" axis.
    n_steps = max(_cdiv(B, batch_tile), 1)
    if n_steps == 1 and B >= 512:
        n_steps = 2
    TB = _round_up(_cdiv(B, n_steps), 8)

    # --- generation-aware VMEM budget --------------------------------------
    try:
        vmem_cap = int(pltpu.get_tpu_info().vmem_capacity_bytes)
    except Exception:  # be robust; assume the smallest (v7x per-TC) VMEM
        vmem_cap = 64 << 20

    def vmem_need(tb):
        return (
            2 * tb * K * 4            # double-buffered f32 x tiles
            + 2 * tb * O * 4          # double-buffered f32 out tiles
            + K * Hp * 2 + Hp * 4     # resident w1 (bf16, 1-buffered) + b1 f32
            + Hp * O * 2 + O * 4      # resident w2 (bf16, 1-buffered) + b2 f32
            + tb * K * 2              # in-kernel bf16 copy of x
            + tb * Hp * (4 + 2)       # f32 fc1 activation + bf16 copy for fc2
            + tb * O * 4)             # f32 fc2 MXU result

    # Shrink TB if the implied working set would not fit this generation.
    while TB > 8 and vmem_need(TB) > vmem_cap - (8 << 20):
        TB = _round_up(TB // 2, 8)
    # TODO(synk): for hidden dims too large to keep w1/w2 VMEM-resident even at
    # TB=8, add an "arbitrary" reduction grid axis over Hp with a f32 VMEM
    # accumulator (pl.when init/finalize) instead of relying on the clamp.

    Bp = _round_up(B, TB)
    x_p = x if Bp == B else jnp.pad(x, ((0, Bp - B), (0, 0)))
    grid = (Bp // TB,)

    vmem_limit = int(min(max(vmem_need(TB) + (4 << 20), 16 << 20),
                         vmem_cap - (4 << 20)))

    # Advisory cost hint for XLA's scheduler.
    flops = 2 * Bp * K * Hp + 2 * Bp * Hp * O
    bytes_accessed = (Bp * K * 4 + K * Hp * 2 + Hp * 4 + Hp * O * 2 + O * 4
                      + Bp * O * 4)

    out = pl.pallas_call(
        _mlp_kernel,
        out_shape=jax.ShapeDtypeStruct((Bp, O), jnp.float32),
        grid_spec=pl.GridSpec(
            grid=grid,
            in_specs=[
                # x: batch-tiled, native f32 (last dim == full array dim).
                pl.BlockSpec((TB, K), lambda i: (i, 0)),
                # Weights/biases: VMEM-resident (constant index_map),
                # single-buffered to halve their footprint.
                pl.BlockSpec((K, Hp), lambda i: (0, 0),
                             pipeline_mode=pl.Buffered(1)),
                pl.BlockSpec((1, Hp), lambda i: (0, 0),
                             pipeline_mode=pl.Buffered(1)),
                pl.BlockSpec((Hp, O), lambda i: (0, 0),
                             pipeline_mode=pl.Buffered(1)),
                pl.BlockSpec((1, O), lambda i: (0, 0),
                             pipeline_mode=pl.Buffered(1)),
            ],
            # Un-padded (TB, O) output: no write amplification for small O,
            # no trailing slice copy over the output-dim.
            out_specs=pl.BlockSpec((TB, O), lambda i: (i, 0)),
        ),
        compiler_params=pltpu.CompilerParams(
            dimension_semantics=("parallel",),
            vmem_limit_bytes=vmem_limit),
        cost_estimate=pl.CostEstimate(
            flops=flops, transcendentals=0, bytes_accessed=bytes_accessed),
    )(x_p, w1_p, b1_p, w2_p, b2_p)

    # Only slice if the batch had to be padded to a tile multiple.
    return out if Bp == B else out[:B]


def init_params(key, input_dim, hidden_dim, output_dim):
    """Deterministic init mimicking nn.Linear default (uniform +-1/sqrt(fan_in)).
    Weights stored transposed relative to PyTorch: (in, out)."""
    k1, k2, k3, k4 = jax.random.split(key, 4)
    bound1 = 1.0 / jnp.sqrt(input_dim)
    bound2 = 1.0 / jnp.sqrt(hidden_dim)
    w1 = jax.random.uniform(k1, (input_dim, hidden_dim), jnp.float32,
                            -bound1, bound1)
    b1 = jax.random.uniform(k2, (1, hidden_dim), jnp.float32, -bound1, bound1)
    w2 = jax.random.uniform(k3, (hidden_dim, output_dim), jnp.float32,
                            -bound2, bound2)
    b2 = jax.random.uniform(k4, (1, output_dim), jnp.float32, -bound2, bound2)
    return w1, b1, w2, b2


if __name__ == "__main__":
    # Small shapes consistent with the module's forward: x is (batch, input_dim)
    batch, input_dim, hidden_dim, output_dim = 8, 32, 64, 16

    key = jax.random.PRNGKey(0)
    kx, kp = jax.random.split(key)
    x = jax.random.normal(kx, (batch, input_dim), jnp.float32)
    w1, b1, w2, b2 = init_params(kp, input_dim, hidden_dim, output_dim)

    # One-time weight prep (pad hidden dim to 128, cast to bf16).
    w1_p, b1_p, w2_p, b2_p = prepare_params(w1, b1, w2, b2)

    out = customer_segmentation_forward(x, w1_p, b1_p, w2_p, b2_p)
    out = jax.block_until_ready(out)

    # Pure-JAX f32 reference (kernel uses bf16 matmul inputs + f32 accumulation,
    # so allow bf16-level tolerance).
    ref = jnp.maximum(x @ w1 + b1, 0.0) @ w2 + b2
    assert out.shape == (batch, output_dim)
    assert jnp.allclose(out, ref, atol=3e-2, rtol=3e-2), (
        float(jnp.max(jnp.abs(out - ref))))

    print("KERNEL_OK")
</pallas_src>

<mosaic_0001>
module attributes {stable_mosaic.version = 11 : i64} {
  func.func @_mlp_kernel(%arg0: i32, %arg1: memref<8x32xf32, #tpu.memory_space<vmem>>, %arg2: memref<32x128xbf16, #tpu.memory_space<vmem>>, %arg3: memref<1x128xf32, #tpu.memory_space<vmem>>, %arg4: memref<128x16xbf16, #tpu.memory_space<vmem>>, %arg5: memref<1x16xf32, #tpu.memory_space<vmem>>, %arg6: memref<8x16xf32, #tpu.memory_space<vmem>>) attributes {dimension_semantics = [#tpu.dimension_semantics<parallel>], iteration_bounds = array<i64: 1>, scalar_prefetch = 0 : i64, scratch_operands = 0 : i64, tpu.core_type = #tpu.core_type<tc>, window_params = [{transform_indices = @transform_0, window_bounds = array<i64: 8, 32>}, {pipeline_mode = #tpu.pipeline_mode<synchronous>, transform_indices = @transform_1, window_bounds = array<i64: 32, 128>}, {pipeline_mode = #tpu.pipeline_mode<synchronous>, transform_indices = @transform_2, window_bounds = array<i64: 1, 128>}, {pipeline_mode = #tpu.pipeline_mode<synchronous>, transform_indices = @transform_3, window_bounds = array<i64: 128, 16>}, {pipeline_mode = #tpu.pipeline_mode<synchronous>, transform_indices = @transform_4, window_bounds = array<i64: 1, 16>}, {transform_indices = @transform_5, window_bounds = array<i64: 8, 16>}]} {
    %c0 = arith.constant 0 : index
    %c0_0 = arith.constant 0 : index
    %0 = vector.load %arg1[%c0, %c0_0] : memref<8x32xf32, #tpu.memory_space<vmem>>, vector<8x32xf32>
    %1 = arith.truncf %0 : vector<8x32xf32> to vector<8x32xbf16>
    %c0_1 = arith.constant 0 : index
    %c0_2 = arith.constant 0 : index
    %2 = vector.load %arg2[%c0_1, %c0_2] : memref<32x128xbf16, #tpu.memory_space<vmem>>, vector<32x128xbf16>
    %cst = arith.constant dense<0.000000e+00> : vector<8x128xf32>
    %3 = tpu.matmul %1, %2, %cst {dimension_numbers = #tpu.dot_dimension_numbers<[1], [0], [0], [1], [0, 0, 1, 1], [], []>} : vector<8x32xbf16>, vector<32x128xbf16>, vector<8x128xf32> -> vector<8x128xf32>
    %c0_3 = arith.constant 0 : index
    %c0_4 = arith.constant 0 : index
    %4 = vector.load %arg3[%c0_3, %c0_4] : memref<1x128xf32, #tpu.memory_space<vmem>>, vector<1x128xf32>
    %5 = vector.broadcast %4 : vector<1x128xf32> to vector<8x128xf32>
    %6 = arith.addf %3, %5 : vector<8x128xf32>
    %cst_5 = arith.constant 0.000000e+00 : f32
    %7 = vector.broadcast %cst_5 : f32 to vector<8x128xf32>
    %8 = arith.maximumf %6, %7 : vector<8x128xf32>
    %9 = arith.truncf %8 : vector<8x128xf32> to vector<8x128xbf16>
    %c0_6 = arith.constant 0 : index
    %c0_7 = arith.constant 0 : index
    %10 = vector.load %arg4[%c0_6, %c0_7] : memref<128x16xbf16, #tpu.memory_space<vmem>>, vector<128x16xbf16>
    %cst_8 = arith.constant dense<0.000000e+00> : vector<8x16xf32>
    %11 = tpu.matmul %9, %10, %cst_8 {dimension_numbers = #tpu.dot_dimension_numbers<[1], [0], [0], [1], [0, 0, 1, 1], [], []>} : vector<8x128xbf16>, vector<128x16xbf16>, vector<8x16xf32> -> vector<8x16xf32>
    %c0_9 = arith.constant 0 : index
    %c0_10 = arith.constant 0 : index
    %12 = vector.load %arg5[%c0_9, %c0_10] : memref<1x16xf32, #tpu.memory_space<vmem>>, vector<1x16xf32>
    %13 = vector.broadcast %12 : vector<1x16xf32> to vector<8x16xf32>
    %14 = arith.addf %11, %13 : vector<8x16xf32>
    %c0_11 = arith.constant 0 : index
    %c0_12 = arith.constant 0 : index
    %15 = vector.load %arg6[%c0_11, %c0_12] : memref<8x16xf32, #tpu.memory_space<vmem>>, vector<8x16xf32>
    tpu.vector_store %arg6[%c0_11, %c0_12], %14 {strides = array<i32>} : memref<8x16xf32, #tpu.memory_space<vmem>>, vector<8x16xf32>,
    return
  }
  func.func @transform_0(%arg0: i32) -> (i32, i32) {
    %c0_i32 = arith.constant 0 : i32
    %c0_i32_0 = arith.constant 0 : i32
    return %arg0, %c0_i32 : i32, i32
  }
  func.func @transform_1(%arg0: i32) -> (i32, i32) {
    %c0_i32 = arith.constant 0 : i32
    %c0_i32_0 = arith.constant 0 : i32
    %c0_i32_1 = arith.constant 0 : i32
    return %c0_i32, %c0_i32_0 : i32, i32
  }
  func.func @transform_2(%arg0: i32) -> (i32, i32) {
    %c0_i32 = arith.constant 0 : i32
    %c0_i32_0 = arith.constant 0 : i32
    %c0_i32_1 = arith.constant 0 : i32
    return %c0_i32, %c0_i32_0 : i32, i32
  }
  func.func @transform_3(%arg0: i32) -> (i32, i32) {
    %c0_i32 = arith.constant 0 : i32
    %c0_i32_0 = arith.constant 0 : i32
    %c0_i32_1 = arith.constant 0 : i32
    return %c0_i32, %c0_i32_0 : i32, i32
  }
  func.func @transform_4(%arg0: i32) -> (i32, i32) {
    %c0_i32 = arith.constant 0 : i32
    %c0_i32_0 = arith.constant 0 : i32
    %c0_i32_1 = arith.constant 0 : i32
    return %c0_i32, %c0_i32_0 : i32, i32
  }
  func.func @transform_5(%arg0: i32) -> (i32, i32) {
    %c0_i32 = arith.constant 0 : i32
    %c0_i32_0 = arith.constant 0 : i32
    return %arg0, %c0_i32 : i32, i32
  }
}

</mosaic_0001>

<bundles_post_ra>
// kernel: tpu_custom_call.1
= control target key start
LH: loop header
LB: loop body
LE: loop exit
PB: predicated region body
PF: predicated region fallthrough
CT: control target
= control target key end

     0   :  { %v308_v1 = vmov 0.0   ;;  %vm309_vm0 = vmmov 0   ;;  %vm47_vm1 = vcmask 261120   ;;  %s383_s0 = inlined_call_operand.vmem [shape: f32[8,32], index: 0, kind: input, shape index: {}]   ;;  %s384_s1 = inlined_call_operand.vmem [shape: bf16[32,128], index: 1, kind: input, shape index: {}]   ;;  %s385_s2 = inlined_call_operand.vmem [shape: f32[1,128], index: 2, kind: input, shape index: {}]   ;;  %s386_s3 = inlined_call_operand.vmem [shape: bf16[128,16], index: 3, kind: input, shape index: {}]   ;;  %s387_s4 = inlined_call_operand.vmem [shape: f32[1,16], index: 4, kind: input, shape index: {}]   ;;  %s388_s5 = inlined_call_operand.hbm [shape: f32[8,16], index: 5, kind: output, shape index: {}]  }
   0x1   :  { %v276_v0 = vld [vmem:[%s384_s1 + $0x8] sm:$0xff]   ;;  %245 = vmatprep.subr.bf16.mxu0 %v308_v1  ;;  %v277_v2 = vld [vmem:[%s384_s1] sm:$0xff]   ;;  %253 = vmatprep.subr.bf16.mxu1 %v308_v1  ;;  %v278_v4 = vld [vmem:[%s386_s3 + $0x38] sm:$0xff]  }
   0x2   :  { %246 = vmatpush3.bf16.msra.mxu0 %v276_v0  ;;  %249 = vmatprep.mubr.msk.bf16.mxu0 %vm309_vm0, %v308_v1  ;;  %v22_v3 = vld [vmem:[%s383_s0] sm:$0xff]  ;;  %v279_v6 = vld [vmem:[%s386_s3 + $0x30] sm:$0xff]   ;;  %v280_v7 = vld [vmem:[%s386_s3 + $0x28] sm:$0xff]  }
   0x3   :  { %247 = vmatprep.subr.bf16.mxu0 %v308_v1  ;;  %269 = vmatprep.mubr.msk.bf16.mxu1 %vm309_vm0, %v308_v1  ;;  %v23_v5 = vpack.c.bf16 %v22_v3, %v22_v3 }
   0x4   :  { %254 = vmatpush3.bf16.msra.mxu1 %v278_v4 }
   0x5   :  { %255 = vmatprep.subr.bf16.mxu1 %v308_v1 }
   0x6   :  { %248 = vmatpush3.bf16.msra.mxu0 %v277_v2 }
   0x8   :  { %256 = vmatpush3.bf16.msra.mxu1 %v279_v6 }
   0x9   :  { %250 = vmatmul.mubr.msk.bf16.vlgmr.msra.gmra.mxu0 %vm47_vm1, %v23_v5  ;;  %257 = vmatprep.subr.bf16.mxu1 %v308_v1 }
   0xa   :  { %10 = vsyncpa [#allocation3], 0  ;;  %v281_v8 = vld [vmem:[%s386_s3 + $0x20] sm:$0xff]   ;;  %v282_v9 = vld [vmem:[%s386_s3 + $0x18] sm:$0xff]   ;;  %s310_s17 = smov [#allocation2]   ;;  %vm204_vm2 = vcmask 130048  }
   0xb   :  { %v283_v10 = vld [vmem:[%s386_s3 + $0x10] sm:$0xff]   ;;  %v284_v11 = vld [vmem:[%s386_s3 + $0x8] sm:$0xff]   ;;  %v285_v12 = vld [vmem:[%s386_s3] sm:$0xff]   ;;  %s212_s18 = sshll.u32 %s310_s17, 4  ;;  %s213_s18 = int_to_ptr.vmem [resolvable:$true] %s212_s18 }
   0xc   :  { %258 = vmatpush3.bf16.msra.mxu1 %v280_v7  ;;  %v220_v13 = vld [vmem:[%s385_s2] ss:$0 sm:$0xff]  ;;  %s286_s2 = scalar_lea.vmem %s213_s18, 128  ;;  %p291_p1 = scmp.lt.s32.totalorder %s213_s18, %s213_s18 }
   0xd   :  { %259 = vmatprep.subr.bf16.mxu1 %v308_v1  ;;  %v224_v21 = vld [vmem:[%s387_s4] ss:$0 sm:$0xff]  ;;  %p287_p0 = scmp.ne.s32.totalorder %s213_s18, %s286_s2  ;;  %p292_p2 = scmp.lt.s32.totalorder %s286_s2, %s286_s2 }
   0xf   :  { %p293_p3 = por %p292_p2, %p291_p1 }
  0x10   :  { %260 = vmatpush3.bf16.msra.mxu1 %v281_v8 }
  0x11   :  { %261 = vmatprep.subr.bf16.mxu1 %v308_v1  ;;  %p294_p4 = pnand %p293_p3, %p287_p0 }
  0x14   :  { %262 = vmatpush3.bf16.msra.mxu1 %v282_v9 }
  0x15   :  { %263 = vmatprep.subr.bf16.mxu1 %v308_v1 }
  0x18   :  { %264 = vmatpush3.bf16.msra.mxu1 %v283_v10 }
  0x19   :  { %265 = vmatprep.subr.bf16.mxu1 %v308_v1 }
  0x1c   :  { %266 = vmatpush3.bf16.msra.mxu1 %v284_v11 }
  0x1d   :  { %267 = vmatprep.subr.bf16.mxu1 %v308_v1 }
  0x20   :  { %268 = vmatpush3.bf16.msra.mxu1 %v285_v12 }
  0xc9   :  { %v85_v14 = vpop.f32.mrf.mxu0 }
  0xca   :  { %v86_v15 = vadd.f32 %v220_v13, %v85_v14 }
  0xcb   :  { %v251_v16 = vpop.f32.mrf.mxu0 }
  0xcc   :  { %v91_v17 = vmax.f32 %v86_v15, 0.0 }
  0xcd   :  { %v88_v18 = vpop.f32.mrf.mxu0 }
  0xce   :  { %v92_v19 = vpack.c.bf16 %v91_v17, %v91_v17 }
  0xcf   :  { %v252_v20 = vpop.f32.mrf.mxu0 }
  0xd0   :  { %270 = vmatmul.mubr.bf16.vlgmr.msra.gmra.mxu1 %v92_v19 }
 0x190   :  { %v198_v22 = vpop.f32.mrf.mxu1 }
 0x191   :  { %v199_v23 = vadd.f32 %v224_v21, %v198_v22 }
 0x192   :  { %v271_v24 = vpop.f32.mrf.mxu1 }
 0x193   :  { %205 = vst.msk [vmem:[#allocation2] sm:$0xff] %vm204_vm2, %v199_v23 }
 0x194   :  { %v201_v25 = vpop.f32.mrf.mxu1 }
 0x195   :  { %297 = shalt.err (!%p294_p4)
}
 0x196   :  { %215 = dma.vmem_to_hbm [thread:$0]  %s213_s18, 128, %s388_s5, [#allocation3]   ;;  %v272_v26 = vpop.f32.mrf.mxu1 }
 0x197   :  { %306 = dma.done.wait [#allocation3], 128  }
 0x198   :  { %307 = vsyncadd [#allocation3], 4294967168 }
 0x199   :  { %219 = vsyncpa [#allocation3], 1 }

</bundles_post_ra>
